<compile_context>
chip_gen: v7x
topology: tpu7x:2x2x1
jax: 0.10.0
libtpu: 0.0.40
codegen_flags: <defaults>
</compile_context>

<pallas_src>
import math

import jax
import jax.numpy as jnp
import numpy as np
from jax.experimental import pallas as pl
from jax.experimental.pallas import tpu as pltpu


def _pick_num_chunks(shape, nbytes):
    """How many parallel chunk DMAs to issue for the selected item."""
    if len(shape) == 0 or shape[0] <= 1 or nbytes < (256 << 10):
        return 1  # small item: one contiguous DMA, setup cost dominates anyway
    kind = ""
    try:
        kind = jax.devices()[0].device_kind.lower()
    except Exception:
        pass
    if "v7" in kind:
        cap = 8   # v7x: many in-flight DMAs needed to approach 3.2 TB/s
    elif "v6" in kind:
        cap = 4   # v6e: one big DMA is already near roofline; modest split
    else:
        cap = 2   # v5e and unknown: prefer 1-2 DMAs
    by_size = max(1, nbytes >> 20)  # keep each chunk >= ~1 MiB
    return int(max(1, min(shape[0], cap, by_size)))


def _chunk_bounds(shape, n_chunks):
    """Static (start, size) splits along the leading dim; [None] == full copy."""
    if n_chunks <= 1 or len(shape) == 0:
        return [None]
    lead = shape[0]
    base, rem = divmod(lead, n_chunks)
    bounds, start = [], 0
    for c in range(n_chunks):
        size = base + (1 if c < rem else 0)
        if size > 0:
            bounds.append((start, size))
            start += size
    return bounds or [None]


def _make_select_kernel(n_items, chunk_bounds):
    """Kernel: start chunk DMAs from the selected HBM item ref, then wait."""

    def kernel(idx_ref, *refs):
        item_refs = refs[:n_items]            # raw HBM refs (memory_space=pl.ANY)
        out_ref = refs[n_items]               # raw HBM output ref
        sem = refs[n_items + 1]               # DMA semaphores, one per chunk
        idx = idx_ref[0]                      # scalar-prefetched index (SMEM)

        def copies(src_ref):
            cps = []
            for c, bnd in enumerate(chunk_bounds):
                if bnd is None:
                    cps.append(pltpu.make_async_copy(src_ref, out_ref, sem.at[c]))
                else:
                    start, size = bnd
                    cps.append(pltpu.make_async_copy(
                        src_ref.at[pl.ds(start, size)],
                        out_ref.at[pl.ds(start, size)],
                        sem.at[c]))
            return cps

        # Start: only the matching item's branch issues the chunk DMAs.
        for i in range(n_items):
            @pl.when(idx == i)
            def _start(i=i):
                for cp in copies(item_refs[i]):
                    cp.start()

        # Wait: hoisted out of the pl.when chain. All items share shape/dtype,
        # so the wait descriptor (bytes per chunk) is identical regardless of
        # which source ref actually fed the DMA.
        for cp in copies(item_refs[0]):
            cp.wait()

    return kernel


def select_item(items, item_index):
    """Pallas equivalent of SelectItem.forward: items[item_index]."""
    items = tuple(items)
    n = len(items)
    if n == 0:
        raise ValueError("select_item needs at least one input item")

    # ---- Static-index fast path: zero-copy view, no kernel launch. ----------
    if isinstance(item_index, (int, np.integer)) and not isinstance(item_index, bool):
        return items[int(item_index)]

    # ---- Dynamic-index path: single-item HBM->HBM DMA selection. ------------
    shape, dtype = items[0].shape, items[0].dtype
    for it in items[1:]:
        if it.shape != shape or it.dtype != dtype:
            raise ValueError(
                "dynamic-index select_item requires all items to share shape/dtype")

    # PyTorch-style negative indexing; out-of-range wraps (deliberate deviation
    # from erroring, documented).
    idx = jnp.mod(jnp.asarray(item_index, dtype=jnp.int32), n).reshape((1,))

    nbytes = int(math.prod(shape)) * jnp.dtype(dtype).itemsize
    n_chunks = _pick_num_chunks(shape, nbytes)
    chunk_bounds = _chunk_bounds(shape, n_chunks)

    grid_spec = pltpu.PrefetchScalarGridSpec(
        num_scalar_prefetch=1,
        grid=(1,),
        in_specs=[pl.BlockSpec(memory_space=pl.ANY) for _ in range(n)],
        out_specs=pl.BlockSpec(memory_space=pl.ANY),
        scratch_shapes=[pltpu.SemaphoreType.DMA((len(chunk_bounds),))],
    )

    return pl.pallas_call(
        _make_select_kernel(n, chunk_bounds),
        grid_spec=grid_spec,
        out_shape=jax.ShapeDtypeStruct(shape, dtype),
        compiler_params=pltpu.CompilerParams(has_side_effects=True),
        cost_estimate=pl.CostEstimate(
            flops=0, transcendentals=0, bytes_accessed=2 * nbytes),
    )(idx, *items)


class SelectItem:
    """Mirror of the PyTorch module, backed by the Pallas path when needed."""

    def __init__(self, item_index):
        self._name = "selectitem"
        self.item_index = item_index

    def __call__(self, inputs):
        return select_item(inputs, self.item_index)


if __name__ == "__main__":
    key = jax.random.PRNGKey(0)
    batch, seq, hidden, n_items = 2, 8, 32, 3
    keys = jax.random.split(key, n_items)
    inputs = tuple(
        jax.random.normal(k, (batch, seq, hidden), dtype=jnp.float32) for k in keys
    )

    # 1) Static constructor index (the PyTorch-spec path): zero-copy fast path.
    mod = SelectItem(1)
    out_static = jax.block_until_ready(mod(inputs))
    assert out_static.shape == inputs[1].shape and out_static.dtype == inputs[1].dtype
    assert bool(jnp.array_equal(out_static, inputs[1])), "static-path mismatch"

    # 2) Dynamic index exercises the Pallas kernel (HBM->HBM DMA of one item).
    out_dyn = jax.block_until_ready(select_item(inputs, jnp.int32(2)))
    assert out_dyn.shape == inputs[2].shape and out_dyn.dtype == inputs[2].dtype
    assert bool(jnp.array_equal(out_dyn, inputs[2])), "dynamic-path mismatch"

    # 3) Negative dynamic index (PyTorch semantics): -1 selects the last item.
    out_neg = jax.block_until_ready(select_item(inputs, jnp.int32(-1)))
    assert bool(jnp.array_equal(out_neg, inputs[n_items - 1])), "negative-index mismatch"

    print("KERNEL_OK")
</pallas_src>

<mosaic_0001>
module attributes {stable_mosaic.version = 11 : i64} {
  func.func @kernel(%arg0: i32, %arg1: memref<1xi32, #tpu.memory_space<smem>>, %arg2: memref<2x8x32xf32, #tpu.memory_space<any>>, %arg3: memref<2x8x32xf32, #tpu.memory_space<any>>, %arg4: memref<2x8x32xf32, #tpu.memory_space<any>>, %arg5: memref<2x8x32xf32, #tpu.memory_space<any>>, %arg6: memref<1x!tpu.dma_semaphore, #tpu.memory_space<semaphore_mem>>) attributes {dimension_semantics = [#tpu.dimension_semantics<arbitrary>], iteration_bounds = array<i64: 1>, scalar_prefetch = 1 : i64, scratch_operands = 1 : i64, tpu.core_type = #tpu.core_type<tc>, window_params = [{}, {}, {}, {}]} {
    %c0 = arith.constant 0 : index
    %0 = memref.load %arg1[%c0] : memref<1xi32, #tpu.memory_space<smem>>
    %c0_i32 = arith.constant 0 : i32
    %1 = arith.cmpi eq, %0, %c0_i32 : i32
    %2 = arith.extui %1 : i1 to i32
    %c0_i32_0 = arith.constant 0 : i32
    %3 = arith.cmpi ne, %2, %c0_i32_0 : i32
    scf.if %3 {
      %c0_i32_4 = arith.constant 0 : i32
      %12 = tpu.memref_slice %arg6[%c0_i32_4] : memref<1x!tpu.dma_semaphore, #tpu.memory_space<semaphore_mem>> -> memref<1x!tpu.dma_semaphore, #tpu.memory_space<semaphore_mem>>
      %13 = tpu.memref_squeeze %12 : memref<1x!tpu.dma_semaphore, #tpu.memory_space<semaphore_mem>> -> memref<!tpu.dma_semaphore, #tpu.memory_space<semaphore_mem>>
      tpu.enqueue_dma source(%arg2 : memref<2x8x32xf32, #tpu.memory_space<any>>) target(%arg5 : memref<2x8x32xf32, #tpu.memory_space<any>>) target_semaphore(%13 : memref<!tpu.dma_semaphore, #tpu.memory_space<semaphore_mem>>)
    } else {
    }
    %c1_i32 = arith.constant 1 : i32
    %4 = arith.cmpi eq, %0, %c1_i32 : i32
    %5 = arith.extui %4 : i1 to i32
    %c0_i32_1 = arith.constant 0 : i32
    %6 = arith.cmpi ne, %5, %c0_i32_1 : i32
    scf.if %6 {
      %c0_i32_4 = arith.constant 0 : i32
      %12 = tpu.memref_slice %arg6[%c0_i32_4] : memref<1x!tpu.dma_semaphore, #tpu.memory_space<semaphore_mem>> -> memref<1x!tpu.dma_semaphore, #tpu.memory_space<semaphore_mem>>
      %13 = tpu.memref_squeeze %12 : memref<1x!tpu.dma_semaphore, #tpu.memory_space<semaphore_mem>> -> memref<!tpu.dma_semaphore, #tpu.memory_space<semaphore_mem>>
      tpu.enqueue_dma source(%arg3 : memref<2x8x32xf32, #tpu.memory_space<any>>) target(%arg5 : memref<2x8x32xf32, #tpu.memory_space<any>>) target_semaphore(%13 : memref<!tpu.dma_semaphore, #tpu.memory_space<semaphore_mem>>)
    } else {
    }
    %c2_i32 = arith.constant 2 : i32
    %7 = arith.cmpi eq, %0, %c2_i32 : i32
    %8 = arith.extui %7 : i1 to i32
    %c0_i32_2 = arith.constant 0 : i32
    %9 = arith.cmpi ne, %8, %c0_i32_2 : i32
    scf.if %9 {
      %c0_i32_4 = arith.constant 0 : i32
      %12 = tpu.memref_slice %arg6[%c0_i32_4] : memref<1x!tpu.dma_semaphore, #tpu.memory_space<semaphore_mem>> -> memref<1x!tpu.dma_semaphore, #tpu.memory_space<semaphore_mem>>
      %13 = tpu.memref_squeeze %12 : memref<1x!tpu.dma_semaphore, #tpu.memory_space<semaphore_mem>> -> memref<!tpu.dma_semaphore, #tpu.memory_space<semaphore_mem>>
      tpu.enqueue_dma source(%arg4 : memref<2x8x32xf32, #tpu.memory_space<any>>) target(%arg5 : memref<2x8x32xf32, #tpu.memory_space<any>>) target_semaphore(%13 : memref<!tpu.dma_semaphore, #tpu.memory_space<semaphore_mem>>)
    } else {
    }
    %c0_i32_3 = arith.constant 0 : i32
    %10 = tpu.memref_slice %arg6[%c0_i32_3] : memref<1x!tpu.dma_semaphore, #tpu.memory_space<semaphore_mem>> -> memref<1x!tpu.dma_semaphore, #tpu.memory_space<semaphore_mem>>
    %11 = tpu.memref_squeeze %10 : memref<1x!tpu.dma_semaphore, #tpu.memory_space<semaphore_mem>> -> memref<!tpu.dma_semaphore, #tpu.memory_space<semaphore_mem>>
    tpu.wait_dma2 semaphore(%11 : memref<!tpu.dma_semaphore, #tpu.memory_space<semaphore_mem>>) src(%arg2 : memref<2x8x32xf32, #tpu.memory_space<any>>) dst(%arg5 : memref<2x8x32xf32, #tpu.memory_space<any>>)
    return
  }
}

</mosaic_0001>

<bundles_post_ra>
// kernel: tpu_custom_call.1
= control target key start
LH: loop header
LB: loop body
LE: loop exit
PB: predicated region body
PF: predicated region fallthrough
CT: control target
= control target key end

     0   :  { %s92_s17 = smov [#allocation2]   ;;  %s93_s18 = smov [#allocation5]   ;;  %s149_s0 = inlined_call_operand.<no memory space> [shape: s32[1], index: 0, kind: input, shape index: {}]   ;;  %s150_s1 = inlined_call_operand.hbm [shape: f32[2,8,32], index: 1, kind: input, shape index: {}]   ;;  %s151_s4 = inlined_call_operand.hbm [shape: f32[2,8,32], index: 4, kind: output, shape index: {}]   ;;  %s152_s2 = inlined_call_operand.hbm [shape: f32[2,8,32], index: 2, kind: input, shape index: {}]   ;;  %s153_s3 = inlined_call_operand.hbm [shape: f32[2,8,32], index: 3, kind: input, shape index: {}]  }
   0x1   :  { %p82_p0 = scmp.eq.s32.totalorder %s149_s0, 0  ;;  %s94_s19 = smov 0  }
   0x2   :  { %p83_p1 = scmp.eq.s32.totalorder %s149_s0, 1  ;;  %p84_p2 = scmp.eq.s32.totalorder %s149_s0, 2 }
   0x3   :  { %77 = dma.general (%p82_p0), %s150_s1, 256, %s151_s4, %s92_s17, %s93_s18, [#allocation6], %s94_s19, 0  }
   0x4   :  { %s95_s28 = smov [#allocation7]   ;;  %s96_s7 = smov [#allocation9]  }
   0x5   :  { %79 = dma.general (%p83_p1), %s152_s2, 256, %s151_s4, %s92_s17, %s95_s28, [#allocation8], %s94_s19, 0  }
   0x6   :  { %81 = dma.general (%p84_p2), %s153_s3, 256, %s151_s4, %s92_s17, %s96_s7, [#allocation10], %s94_s19, 0  }
   0x7   :  { %90 = dma.done.wait [#allocation2], 256 }
   0x8   :  { %91 = vsyncadd [#allocation2], 4294967040 }
   0x9   :  { %66 = vsyncmov [#allocation2] }
   0xc   :  { %s67_s0 = vpop.sfrf %66 }
   0xd   :  { %p75_p3 = scmp.ne.s32.totalorder %s67_s0, 0 }
   0xf   :  { %71 = shalt.err (%p75_p3)  }

</bundles_post_ra>
